<compile_context>
chip_gen: v5e
topology: v5e:2x2
jax: 0.10.0
libtpu: 0.0.40
codegen_flags: <defaults>
</compile_context>

<pallas_src>
import functools
import math

import jax
import jax.numpy as jnp
from jax.experimental import pallas as pl
from jax.experimental.pallas import tpu as pltpu


def _linkpred_kernel(idx_ref, emb_t_ref, w1_ref, b1_ref, w2_ref, b2_ref, *rest,
                     temp, inter_min, inter_max, n_edges, is_training):
    """One (·, E_TILE) slab of edges, edges on the 128-lane axis.

    idx_ref   : (2, T) int32   sender/receiver feature ids
    emb_t_ref : (D, nf) f32    embedding table^T, VMEM-resident (constant map)
    w1_ref    : (H, D) f32     torch linear1.weight layout
    b1_ref    : (H, 1) f32
    w2_ref    : (H, 1) f32     linear2.weight^T (already +0.2 shifted)
    b2_ref    : (1, 1) f32
    [u_ref]   : (1, T) f32     uniform noise (training only)
    s_out_ref : (1, T) f32     gate values
    pen_ref   : (1, 128) f32   per-tile L0-penalty partial sum (lane 0)
    """
    if is_training:
        u_ref, s_out_ref, pen_ref = rest
    else:
        s_out_ref, pen_ref = rest
        u_ref = None

    f32 = jnp.float32
    nf = emb_t_ref.shape[1]
    T = idx_ref.shape[1]

    # --- fused embedding gather (one-hot -> single MXU matmul of width 2T) ---
    idx = idx_ref[...]                                            # (2, T)
    idx2 = jnp.concatenate([idx[0:1, :], idx[1:2, :]], axis=1)    # (1, 2T)
    feat = jax.lax.broadcasted_iota(jnp.int32, (nf, 1), 0)        # (nf, 1)
    oh = (feat == idx2).astype(f32)                               # (nf, 2T), exact 0/1
    gathered = jnp.dot(emb_t_ref[...], oh,
                       preferred_element_type=f32)                # (D, 2T)
    send = gathered[:, :T]                                        # (D, T)
    recv = gathered[:, T:]                                        # (D, T)

    # _input = sender_emb * receiver_emb
    x = send * recv                                               # (D, T)

    # h_relu = relu(linear1(_input))  (torch weight layout, no transpose needed)
    h = jnp.dot(w1_ref[...], x, preferred_element_type=f32) + b1_ref[...]   # (H, T)
    h = jnp.maximum(h, 0.0)
    # Dropout(p=0.5) -> identity (see module-level TODO).

    # loc = linear2(h_relu): N=1 contraction on the VPU/XLU, not the MXU.
    loc = jnp.sum(h * w2_ref[...], axis=0, keepdims=True) + b2_ref[...]     # (1, T)

    inv_ln2 = 1.0 / math.log(2.0)
    if is_training:
        u = jnp.clip(u_ref[...], 1e-6, 1.0 - 1e-6)                # avoid log(0)
        logit_u = (jnp.log(u) - jnp.log(1.0 - u)) * inv_ln2       # log2(u) - log2(1-u)
        s = jax.nn.sigmoid((loc + logit_u) / temp)
    else:
        s = jax.nn.sigmoid(loc)
    s = jnp.clip(s * (inter_max - inter_min) + inter_min, 0.0, 1.0)
    s_out_ref[...] = s

    # Per-tile L0-penalty partial sum (mask the ragged tail of the last tile).
    shift = temp * math.log2(-inter_min / inter_max)              # compile-time const
    pen = jax.nn.sigmoid(loc - shift)                             # (1, T)
    gidx = pl.program_id(0) * T + jax.lax.broadcasted_iota(jnp.int32, (1, T), 1)
    pen = jnp.where(gidx < n_edges, pen, 0.0)
    total = jnp.sum(pen, axis=1, keepdims=True)                   # (1, 1)
    lane = jax.lax.broadcasted_iota(jnp.int32, (1, 128), 1)
    pen_ref[...] = jnp.where(lane == 0, total, 0.0)               # lane-dense store


def _round_up(x, m):
    return (x + m - 1) // m * m


def _vmem_bytes(T, nf, D, H, training):
    """Rough per-tile VMEM footprint (bytes) of the kernel above."""
    f = 4
    io = 2 * (2 * T * 4)                                  # idx, double-buffered
    io += 2 * (T * f) if training else 0                  # u
    io += 2 * ((D * nf + H * D + 2 * H + 1) * f)          # params (small)
    io += 2 * (T * f + 128 * f)                           # outputs
    live = (2 * nf * T                                    # one-hot (nf, 2T)
            + 2 * D * T                                   # gathered (D, 2T)
            + D * T                                       # x
            + H * T                                       # h
            + 8 * T) * f                                  # loc / s / pen / masks
    return io + live


def linkpred_forward(sender_receiver, params, l0_para, is_training, u=None,
                     e_tile=16384):
    """sender_receiver: (2, E) int32 indices.

    Returns (s, l0_penalty) with s of shape (E, 1) and a scalar penalty,
    matching the torch module's forward.
    """
    temp, inter_min, inter_max = (float(v) for v in l0_para)
    emb = params["emb"]                                           # (n_feature, D)
    n_feature, D = emb.shape
    H = params["w1"].shape[0]
    E = int(sender_receiver.shape[1])

    # --- edge tile sizing (edges on the lane axis -> multiples of 128) -------
    target = int(e_tile)
    if E > 256:
        # Keep at least two grid steps so a v7x megacore can shard the edge axis.
        target = min(target, _round_up(-(-E // 2), 128))
    E_TILE = max(128, _round_up(min(target, E), 128))

    # Shrink the tile until the footprint fits comfortably in v7x's 64 MiB VMEM.
    VMEM_CAP = 64 * 1024 * 1024
    while (_vmem_bytes(E_TILE, n_feature, D, H, is_training) * 5) // 4 > VMEM_CAP \
            and E_TILE > 128:
        E_TILE = max(128, _round_up(E_TILE // 2, 128))
    est = _vmem_bytes(E_TILE, n_feature, D, H, is_training)
    if (est * 5) // 4 > VMEM_CAP:
        raise ValueError(
            "n_feature too large for the VMEM-resident one-hot gather path "
            "(a DMA-gather fallback is required).")
    vmem_limit = int(min(VMEM_CAP, max(2 * est, 32 * 1024 * 1024)))

    E_pad = _round_up(E, E_TILE)
    n_tiles = E_pad // E_TILE
    pad = E_pad - E

    idx = jnp.pad(sender_receiver.astype(jnp.int32), ((0, 0), (0, pad)))  # (2, E_pad)
    emb_t = jnp.transpose(emb).astype(jnp.float32)                # (D, n_feature)
    w1 = params["w1"].astype(jnp.float32)                         # (H, D)
    b1 = params["b1"].astype(jnp.float32)                         # (H, 1)
    w2 = params["w2"].astype(jnp.float32)                         # (H, 1)
    b2 = params["b2"].astype(jnp.float32)                         # (1, 1)

    edge_spec = lambda: pl.BlockSpec((1, E_TILE), lambda i: (0, i))
    const_spec = lambda a: pl.BlockSpec(a.shape, lambda i: (0, 0))

    in_specs = [
        pl.BlockSpec((2, E_TILE), lambda i: (0, i)),   # fused sender/receiver ids
        const_spec(emb_t),                             # embedding table (VMEM-resident)
        const_spec(w1), const_spec(b1), const_spec(w2), const_spec(b2),
    ]
    inputs = [idx, emb_t, w1, b1, w2, b2]

    if is_training:
        if u is None:
            raise ValueError("training path requires the uniform noise `u`")
        u_row = jnp.pad(jnp.reshape(u.astype(jnp.float32), (1, E)),
                        ((0, 0), (0, pad)), constant_values=0.5)  # (1, E_pad)
        in_specs.append(edge_spec())
        inputs.append(u_row)

    kernel = functools.partial(
        _linkpred_kernel, temp=temp, inter_min=inter_min, inter_max=inter_max,
        n_edges=E, is_training=bool(is_training))

    s_row, pen_part = pl.pallas_call(
        kernel,
        grid=(n_tiles,),
        in_specs=in_specs,
        out_specs=[edge_spec(), pl.BlockSpec((1, 128), lambda i: (0, i))],
        out_shape=[
            jax.ShapeDtypeStruct((1, E_pad), jnp.float32),        # s (lane-dense)
            jax.ShapeDtypeStruct((1, n_tiles * 128), jnp.float32),  # pen partial sums
        ],
        compiler_params=pltpu.CompilerParams(
            # No cross-tile state -> edge axis shardable across TCs (v7x).
            dimension_semantics=("parallel",),
            vmem_limit_bytes=vmem_limit),
    )(*inputs)

    s = s_row[0, :E].reshape(E, 1)
    l0_penalty = jnp.sum(pen_part) / E
    return s, l0_penalty


def init_params(key, n_feature, D_in, H):
    """Parameters in torch-native layouts (w1: (H, D_in); w2 stored as (H, 1))."""
    k_emb, k_w1, k_b1, k_w2, k_b2 = jax.random.split(key, 5)
    # feature_emb_edge.weight ~ Normal(mean=0.2, std=0.01)
    emb = 0.2 + 0.01 * jax.random.normal(k_emb, (n_feature, D_in), jnp.float32)
    # linear1: torch default uniform(-1/sqrt(fan_in), 1/sqrt(fan_in)).
    b1lim = 1.0 / math.sqrt(D_in)
    w1 = jax.random.uniform(k_w1, (H, D_in), jnp.float32, -b1lim, b1lim)
    b1 = jax.random.uniform(k_b1, (H, 1), jnp.float32, -b1lim, b1lim)
    # linear2 with the +0.2 weight shift from __init__; stored as a column (H, 1).
    b2lim = 1.0 / math.sqrt(H)
    w2 = jax.random.uniform(k_w2, (H, 1), jnp.float32, -b2lim, b2lim) + 0.2
    b2 = jax.random.uniform(k_b2, (1, 1), jnp.float32, -b2lim, b2lim)
    return {"emb": emb, "w1": w1, "b1": b1, "w2": w2, "b2": b2}


def _reference_forward(sender_receiver, params, l0_para, is_training, u=None):
    """Pure-JAX reference mirroring the torch forward (edge-major, feature-last)."""
    temp, inter_min, inter_max = (float(v) for v in l0_para)
    emb = params["emb"]
    se = emb[sender_receiver[0]]
    re = emb[sender_receiver[1]]
    x = se * re                                                   # (E, D)
    h = jnp.maximum(x @ params["w1"].T + params["b1"][:, 0], 0.0)  # (E, H)
    loc = h @ params["w2"] + params["b2"][0, 0]                   # (E, 1)
    if is_training:
        s = jax.nn.sigmoid((loc + jnp.log2(u) - jnp.log2(1.0 - u)) / temp)
    else:
        s = jax.nn.sigmoid(loc)
    s = jnp.clip(s * (inter_max - inter_min) + inter_min, 0.0, 1.0)
    pen = jnp.mean(jax.nn.sigmoid(loc - temp * math.log2(-inter_min / inter_max)))
    return s, pen


def _check(sr, params, l0_para, u):
    E = sr.shape[1]
    s_e, p_e = linkpred_forward(sr, params, l0_para, is_training=False)
    s_t, p_t = linkpred_forward(sr, params, l0_para, is_training=True, u=u)
    jax.block_until_ready((s_e, p_e, s_t, p_t))
    assert s_e.shape == (E, 1) and s_t.shape == (E, 1)
    assert p_e.shape == () and p_t.shape == ()
    assert bool(jnp.all(s_e >= 0.0)) and bool(jnp.all(s_e <= 1.0))
    assert bool(jnp.all(jnp.isfinite(s_t))) and bool(jnp.isfinite(p_t))
    s_re, p_re = _reference_forward(sr, params, l0_para, False)
    s_rt, p_rt = _reference_forward(sr, params, l0_para, True, u=u)
    assert bool(jnp.allclose(s_e, s_re, atol=1e-3, rtol=1e-3))
    assert bool(jnp.allclose(p_e, p_re, atol=1e-3, rtol=1e-3))
    assert bool(jnp.allclose(s_t, s_rt, atol=1e-3, rtol=1e-3))
    assert bool(jnp.allclose(p_t, p_rt, atol=1e-3, rtol=1e-3))


if __name__ == "__main__":
    n_feature, D_in, H = 32, 16, 32
    l0_para = (0.66, -0.1, 1.1)   # (temp, inter_min, inter_max)

    key = jax.random.PRNGKey(0)
    k_params, k_sr1, k_u1, k_sr2, k_u2 = jax.random.split(key, 5)
    params = init_params(k_params, n_feature, D_in, H)

    # Tiny single-tile case.
    E1 = 8
    sr1 = jax.random.randint(k_sr1, (2, E1), 0, n_feature, dtype=jnp.int32)
    u1 = jax.random.uniform(k_u1, (E1, 1), jnp.float32, minval=1e-4, maxval=1.0 - 1e-4)
    _check(sr1, params, l0_para, u1)

    # Multi-tile, ragged case (exercises grid pipelining + tail masking).
    E2 = 1000
    sr2 = jax.random.randint(k_sr2, (2, E2), 0, n_feature, dtype=jnp.int32)
    u2 = jax.random.uniform(k_u2, (E2, 1), jnp.float32, minval=1e-4, maxval=1.0 - 1e-4)
    _check(sr2, params, l0_para, u2)

    print("KERNEL_OK")
</pallas_src>

<mosaic_0001>
module attributes {stable_mosaic.version = 11 : i64} {
  func.func @_linkpred_kernel(%arg0: i32, %arg1: memref<2x128xi32, #tpu.memory_space<vmem>>, %arg2: memref<16x32xf32, #tpu.memory_space<vmem>>, %arg3: memref<32x16xf32, #tpu.memory_space<vmem>>, %arg4: memref<32x1xf32, #tpu.memory_space<vmem>>, %arg5: memref<32x1xf32, #tpu.memory_space<vmem>>, %arg6: memref<1x1xf32, #tpu.memory_space<vmem>>, %arg7: memref<1x128xf32, #tpu.memory_space<vmem>>, %arg8: memref<1x128xf32, #tpu.memory_space<vmem>>) attributes {dimension_semantics = [#tpu.dimension_semantics<parallel>], iteration_bounds = array<i64: 1>, scalar_prefetch = 0 : i64, scratch_operands = 0 : i64, tpu.core_type = #tpu.core_type<tc>, window_params = [{transform_indices = @transform_0, window_bounds = array<i64: 2, 128>}, {pipeline_mode = #tpu.pipeline_mode<synchronous>, transform_indices = @transform_1, window_bounds = array<i64: 16, 32>}, {pipeline_mode = #tpu.pipeline_mode<synchronous>, transform_indices = @transform_2, window_bounds = array<i64: 32, 16>}, {pipeline_mode = #tpu.pipeline_mode<synchronous>, transform_indices = @transform_3, window_bounds = array<i64: 32, 1>}, {pipeline_mode = #tpu.pipeline_mode<synchronous>, transform_indices = @transform_4, window_bounds = array<i64: 32, 1>}, {pipeline_mode = #tpu.pipeline_mode<synchronous>, transform_indices = @transform_5, window_bounds = array<i64: 1, 1>}, {transform_indices = @transform_6, window_bounds = array<i64: 1, 128>}, {transform_indices = @transform_7, window_bounds = array<i64: 1, 128>}]} {
    %c0 = arith.constant 0 : index
    %c0_0 = arith.constant 0 : index
    %0 = vector.load %arg1[%c0, %c0_0] : memref<2x128xi32, #tpu.memory_space<vmem>>, vector<2x128xi32>
    %1 = vector.extract_strided_slice %0 {offsets = [0, 0], sizes = [1, 128], strides = [1, 1]} : vector<2x128xi32> to vector<1x128xi32>
    %2 = vector.extract_strided_slice %0 {offsets = [1, 0], sizes = [1, 128], strides = [1, 1]} : vector<2x128xi32> to vector<1x128xi32>
    %3 = tpu.concatenate %1, %2 in 1 : vector<1x128xi32>, vector<1x128xi32> -> vector<1x256xi32>
    %4 = tpu.iota {dimensions = array<i32: 0>} : vector<32x1xi32>
    %5 = vector.broadcast %4 : vector<32x1xi32> to vector<32x256xi32>
    %6 = vector.broadcast %3 : vector<1x256xi32> to vector<32x256xi32>
    %7 = arith.cmpi eq, %5, %6 : vector<32x256xi32>
    %8 = arith.extui %7 : vector<32x256xi1> to vector<32x256xi32>
    %9 = arith.sitofp %8 : vector<32x256xi32> to vector<32x256xf32>
    %c0_1 = arith.constant 0 : index
    %c0_2 = arith.constant 0 : index
    %10 = vector.load %arg2[%c0_1, %c0_2] : memref<16x32xf32, #tpu.memory_space<vmem>>, vector<16x32xf32>
    %cst = arith.constant dense<0.000000e+00> : vector<16x256xf32>
    %11 = tpu.matmul %10, %9, %cst {dimension_numbers = #tpu.dot_dimension_numbers<[1], [0], [0], [1], [0, 0, 1, 1], [], []>} : vector<16x32xf32>, vector<32x256xf32>, vector<16x256xf32> -> vector<16x256xf32>
    %12 = vector.extract_strided_slice %11 {offsets = [0, 0], sizes = [16, 128], strides = [1, 1]} : vector<16x256xf32> to vector<16x128xf32>
    %13 = vector.extract_strided_slice %11 {offsets = [0, 128], sizes = [16, 128], strides = [1, 1]} : vector<16x256xf32> to vector<16x128xf32>
    %14 = arith.mulf %12, %13 : vector<16x128xf32>
    %c0_3 = arith.constant 0 : index
    %c0_4 = arith.constant 0 : index
    %15 = vector.load %arg3[%c0_3, %c0_4] : memref<32x16xf32, #tpu.memory_space<vmem>>, vector<32x16xf32>
    %cst_5 = arith.constant dense<0.000000e+00> : vector<32x128xf32>
    %16 = tpu.matmul %15, %14, %cst_5 {dimension_numbers = #tpu.dot_dimension_numbers<[1], [0], [0], [1], [0, 0, 1, 1], [], []>} : vector<32x16xf32>, vector<16x128xf32>, vector<32x128xf32> -> vector<32x128xf32>
    %c0_6 = arith.constant 0 : index
    %c0_7 = arith.constant 0 : index
    %17 = vector.load %arg4[%c0_6, %c0_7] : memref<32x1xf32, #tpu.memory_space<vmem>>, vector<32x1xf32>
    %18 = vector.broadcast %17 : vector<32x1xf32> to vector<32x128xf32>
    %19 = arith.addf %16, %18 : vector<32x128xf32>
    %cst_8 = arith.constant 0.000000e+00 : f32
    %20 = vector.broadcast %cst_8 : f32 to vector<32x128xf32>
    %21 = arith.maximumf %19, %20 : vector<32x128xf32>
    %c0_9 = arith.constant 0 : index
    %c0_10 = arith.constant 0 : index
    %22 = vector.load %arg5[%c0_9, %c0_10] : memref<32x1xf32, #tpu.memory_space<vmem>>, vector<32x1xf32>
    %23 = vector.broadcast %22 : vector<32x1xf32> to vector<32x128xf32>
    %24 = arith.mulf %21, %23 : vector<32x128xf32>
    %cst_11 = arith.constant dense<0.000000e+00> : vector<128xf32>
    %25 = vector.multi_reduction <add>, %24, %cst_11 [0] : vector<32x128xf32> to vector<128xf32>
    %26 = vector.shape_cast %25 : vector<128xf32> to vector<1x128xf32>
    %c0_12 = arith.constant 0 : index
    %c0_13 = arith.constant 0 : index
    %27 = vector.load %arg6[%c0_12, %c0_13] : memref<1x1xf32, #tpu.memory_space<vmem>>, vector<1x1xf32>
    %28 = vector.broadcast %27 : vector<1x1xf32> to vector<1x128xf32>
    %29 = arith.addf %26, %28 : vector<1x128xf32>
    %30 = arith.negf %29 : vector<1x128xf32>
    %31 = math.exp %30 : vector<1x128xf32>
    %cst_14 = arith.constant 1.000000e+00 : f32
    %32 = vector.broadcast %cst_14 : f32 to vector<1x128xf32>
    %33 = arith.addf %32, %31 : vector<1x128xf32>
    %34 = arith.divf %32, %33 : vector<1x128xf32>
    %cst_15 = arith.constant 1.200000e+00 : f32
    %35 = vector.broadcast %cst_15 : f32 to vector<1x128xf32>
    %36 = arith.mulf %34, %35 : vector<1x128xf32>
    %cst_16 = arith.constant -1.000000e-01 : f32
    %37 = vector.broadcast %cst_16 : f32 to vector<1x128xf32>
    %38 = arith.addf %36, %37 : vector<1x128xf32>
    %cst_17 = arith.constant 0.000000e+00 : f32
    %cst_18 = arith.constant 1.000000e+00 : f32
    %39 = vector.broadcast %cst_17 : f32 to vector<1x128xf32>
    %40 = arith.maximumf %39, %38 : vector<1x128xf32>
    %41 = vector.broadcast %cst_18 : f32 to vector<1x128xf32>
    %42 = arith.minimumf %41, %40 : vector<1x128xf32>
    %c0_19 = arith.constant 0 : index
    %c0_20 = arith.constant 0 : index
    %43 = vector.load %arg7[%c0_19, %c0_20] : memref<1x128xf32, #tpu.memory_space<vmem>>, vector<1x128xf32>
    tpu.vector_store %arg7[%c0_19, %c0_20], %42 {strides = array<i32>} : memref<1x128xf32, #tpu.memory_space<vmem>>, vector<1x128xf32>,
    %cst_21 = arith.constant -2.28322482 : f32
    %44 = vector.broadcast %cst_21 : f32 to vector<1x128xf32>
    %45 = arith.subf %29, %44 : vector<1x128xf32>
    %46 = arith.negf %45 : vector<1x128xf32>
    %47 = math.exp %46 : vector<1x128xf32>
    %cst_22 = arith.constant 1.000000e+00 : f32
    %48 = vector.broadcast %cst_22 : f32 to vector<1x128xf32>
    %49 = arith.addf %48, %47 : vector<1x128xf32>
    %50 = arith.divf %48, %49 : vector<1x128xf32>
    %c128_i32 = arith.constant 128 : i32
    %51 = arith.muli %arg0, %c128_i32 : i32
    %52 = tpu.iota {dimensions = array<i32: 1>} : vector<1x128xi32>
    %53 = vector.broadcast %51 : i32 to vector<1x128xi32>
    %54 = arith.addi %53, %52 : vector<1x128xi32>
    %c8_i32 = arith.constant 8 : i32
    %55 = vector.broadcast %c8_i32 : i32 to vector<1x128xi32>
    %56 = arith.cmpi slt, %54, %55 : vector<1x128xi32>
    %cst_23 = arith.constant 0.000000e+00 : f32
    %57 = vector.broadcast %cst_23 : f32 to vector<1x128xf32>
    %58 = arith.select %56, %50, %57 : vector<1x128xi1>, vector<1x128xf32>
    %cst_24 = arith.constant dense<0.000000e+00> : vector<1xf32>
    %59 = vector.multi_reduction <add>, %58, %cst_24 [1] : vector<1x128xf32> to vector<1xf32>
    %60 = vector.shape_cast %59 : vector<1xf32> to vector<1x1xf32>
    %61 = tpu.iota {dimensions = array<i32: 1>} : vector<1x128xi32>
    %c0_i32 = arith.constant 0 : i32
    %62 = vector.broadcast %c0_i32 : i32 to vector<1x128xi32>
    %63 = arith.cmpi eq, %61, %62 : vector<1x128xi32>
    %cst_25 = arith.constant 0.000000e+00 : f32
    %64 = vector.shape_cast %60 : vector<1x1xf32> to vector<1x1xf32>
    %65 = vector.broadcast %64 : vector<1x1xf32> to vector<1x128xf32>
    %66 = vector.broadcast %cst_25 : f32 to vector<1x128xf32>
    %67 = arith.select %63, %65, %66 : vector<1x128xi1>, vector<1x128xf32>
    %c0_26 = arith.constant 0 : index
    %c0_27 = arith.constant 0 : index
    %68 = vector.load %arg8[%c0_26, %c0_27] : memref<1x128xf32, #tpu.memory_space<vmem>>, vector<1x128xf32>
    tpu.vector_store %arg8[%c0_26, %c0_27], %67 {strides = array<i32>} : memref<1x128xf32, #tpu.memory_space<vmem>>, vector<1x128xf32>,
    return
  }
  func.func @transform_0(%arg0: i32) -> (i32, i32) {
    %c0_i32 = arith.constant 0 : i32
    %c0_i32_0 = arith.constant 0 : i32
    return %c0_i32, %arg0 : i32, i32
  }
  func.func @transform_1(%arg0: i32) -> (i32, i32) {
    %c0_i32 = arith.constant 0 : i32
    %c0_i32_0 = arith.constant 0 : i32
    %c0_i32_1 = arith.constant 0 : i32
    return %c0_i32, %c0_i32_0 : i32, i32
  }
  func.func @transform_2(%arg0: i32) -> (i32, i32) {
    %c0_i32 = arith.constant 0 : i32
    %c0_i32_0 = arith.constant 0 : i32
    %c0_i32_1 = arith.constant 0 : i32
    return %c0_i32, %c0_i32_0 : i32, i32
  }
  func.func @transform_3(%arg0: i32) -> (i32, i32) {
    %c0_i32 = arith.constant 0 : i32
    %c0_i32_0 = arith.constant 0 : i32
    %c0_i32_1 = arith.constant 0 : i32
    return %c0_i32, %c0_i32_0 : i32, i32
  }
  func.func @transform_4(%arg0: i32) -> (i32, i32) {
    %c0_i32 = arith.constant 0 : i32
    %c0_i32_0 = arith.constant 0 : i32
    %c0_i32_1 = arith.constant 0 : i32
    return %c0_i32, %c0_i32_0 : i32, i32
  }
  func.func @transform_5(%arg0: i32) -> (i32, i32) {
    %c0_i32 = arith.constant 0 : i32
    %c0_i32_0 = arith.constant 0 : i32
    %c0_i32_1 = arith.constant 0 : i32
    return %c0_i32, %c0_i32_0 : i32, i32
  }
  func.func @transform_6(%arg0: i32) -> (i32, i32) {
    %c0_i32 = arith.constant 0 : i32
    %c0_i32_0 = arith.constant 0 : i32
    return %c0_i32, %arg0 : i32, i32
  }
  func.func @transform_7(%arg0: i32) -> (i32, i32) {
    %c0_i32 = arith.constant 0 : i32
    %c0_i32_0 = arith.constant 0 : i32
    return %c0_i32, %arg0 : i32, i32
  }
}

</mosaic_0001>

<bundles_post_ra>
// kernel: tpu_custom_call.1
= control target key start
LH: loop header
LB: loop body
LE: loop exit
PB: predicated region body
PF: predicated region fallthrough
CT: control target
= control target key end

     0   :  { %s522_s0 = inlined_call_operand.vmem [shape: s32[2,128], index: 0, kind: input, shape index: {}]   ;;  %s523_s1 = inlined_call_operand.vmem [shape: f32[16,32], index: 1, kind: input, shape index: {}]   ;;  %s524_s2 = inlined_call_operand.vmem [shape: f32[32,16], index: 2, kind: input, shape index: {}]   ;;  %s525_s3 = inlined_call_operand.vmem [shape: f32[32,1], index: 3, kind: input, shape index: {}]   ;;  %s526_s4 = inlined_call_operand.vmem [shape: f32[32,1], index: 4, kind: input, shape index: {}]   ;;  %s527_s5 = inlined_call_operand.<no memory space> [shape: f32[1,1], index: 5, kind: input, shape index: {}]   ;;  %s528_s6 = inlined_call_operand.hbm [shape: f32[1,128], index: 6, kind: output, shape index: {0}]   ;;  %s529_s7 = inlined_call_operand.hbm [shape: f32[1,128], index: 7, kind: output, shape index: {1}]  }
   0x1   :  { %v13_v0 = vstv %s527_s5 }
   0x2   :  { %14 = vst [vmem:[#allocation2] sm:$0x1] %v13_v0 }
   0x3   :  { %15 = vsyncpa [#allocation4], 0  ;;  %v29_v1 = vld [vmem:[%s522_s0] sm:$0x3]  ;;  %v31_v2 = vlaneseq }
   0x4   :  { %v30_v3 = vrot.slane %v29_v1, 1 }
   0x5   :  { %16 = vsyncpa [#allocation6], 0  ;;  %v32_v4 = vshrl.u32 %v31_v2, 7  ;;  %v36_v5 = vperm.slane %v29_v1, 0  ;;  %v422_v10 = vmov 1.0   ;;  %v62_v11 = vld [vmem:[%s523_s1] sm:$0xff] }
   0x6   :  { %v37_v6 = vperm.slane %v30_v3, 0  ;;  %vm64_vm8 = vcmask 261120   ;;  %v63_v12 = vld [vmem:[%s523_s1 + $0x8] sm:$0xff]  ;;  %v123_v13 = vld [vmem:[%s525_s3] sm:$0xff]  ;;  %v125_v14 = vld [vmem:[%s525_s3 + $0x10] sm:$0xff]  ;;  %v423_v15 = vmov 0  }
   0x7   :  { %v35_v7 = vadd.s32 24, %v32_v4  ;;  %v34_v8 = vadd.s32 16, %v32_v4  ;;  %v33_v9 = vadd.s32 8, %v32_v4  ;;  %vm38_vm6 = vcmp.eq.s32.totalorder %v32_v4, %v36_v5  ;;  %359 = vset.pattern.permute.xlu0 %v423_v15  ;;  %360 = vset.pattern.permute.xlu1 %v423_v15  ;;  %v124_v16 = vld [vmem:[%s525_s3 + $0x8] sm:$0xff]  ;;  %v126_v17 = vld [vmem:[%s525_s3 + $0x18] sm:$0xff]  ;;  %v195_v18 = vld [vmem:[%s526_s4 + $0x10] sm:$0xff] }
   0x8   :  { %vm39_vm7 = vcmp.eq.s32.totalorder %v32_v4, %v37_v6  ;;  %129 = vperm.xlu0 %359, %v123_v13   ;;  %139 = vperm.xlu1 %360, %v125_v14   ;;  %v196_v19 = vld [vmem:[%s526_s4 + $0x18] sm:$0xff]  ;;  %v193_v20 = vld [vmem:[%s526_s4] sm:$0xff]  ;;  %v194_v23 = vld [vmem:[%s526_s4 + $0x8] sm:$0xff]  ;;  %vm147_vm9 = vcmask 130048   ;;  %s301_s29 = sshll.u32 %s528_s6, 4  ;;  %s425_s30 = smov [#allocation5]   ;;  %s302_s29 = int_to_ptr.hbm [resolvable:$true] %s301_s29 }
   0x9   :  { %vm44_vm0 = vcmp.eq.s32.totalorder %v35_v7, %v36_v5  ;;  %vm45_vm1 = vcmp.eq.s32.totalorder %v35_v7, %v37_v6  ;;  %vm42_vm2 = vcmp.eq.s32.totalorder %v34_v8, %v36_v5  ;;  %vm43_vm3 = vcmp.eq.s32.totalorder %v34_v8, %v37_v6  ;;  %361 = vset.pattern.permute.xlu2 %v423_v15  ;;  %v119_v28 = vld [vmem:[%s524_s2] sm:$0xff]  ;;  %v120_v29 = vld [vmem:[%s524_s2 + $0x8] sm:$0xff]  ;;  %v121_v31 = vld [vmem:[%s524_s2 + $0x10] sm:$0xff]  ;;  %s310_s8 = sshll.u32 %s425_s30, 4  ;;  %s312_s11 = sshll.u32 %s529_s7, 4  ;;  %s311_s8 = int_to_ptr.vmem [resolvable:$true] %s310_s8  ;;  %s313_s11 = int_to_ptr.hbm [resolvable:$true] %s312_s11 }
   0xa   :  { %334 = vmatpush.msk.msra.mxu0 %vm44_vm0, %v422_v10  ;;  %340 = vmatpush.msk.msra.mxu1 %vm45_vm1, %v422_v10  ;;  %vm40_vm4 = vcmp.eq.s32.totalorder %v33_v9, %v36_v5  ;;  %vm41_vm5 = vcmp.eq.s32.totalorder %v33_v9, %v37_v6  ;;  %v230_v30 = vld [vmem:[#allocation2] sm:$0x1]  ;;  %v122_v32 = vld [vmem:[%s524_s2 + $0x18] sm:$0xff]  ;;  %s424_s2 = smov [#allocation3]  }
   0xb   :  { %199 = vperm.xlu2 %361, %v193_v20   ;;  %s299_s0 = sshll.u32 %s424_s2, 4  ;;  %s300_s0 = int_to_ptr.vmem [resolvable:$true] %s299_s0 }
   0xc   :  { %335 = vmatpush.msk.msra.mxu0 %vm42_vm2, %v422_v10  ;;  %341 = vmatpush.msk.msra.mxu1 %vm43_vm3, %v422_v10 }
   0xe   :  { %336 = vmatpush.msk.msra.mxu0 %vm40_vm4, %v422_v10  ;;  %342 = vmatpush.msk.msra.mxu1 %vm41_vm5, %v422_v10 }
  0x10   :  { %337 = vmatpush.msk.msra.mxu0 %vm38_vm6, %v422_v10  ;;  %343 = vmatpush.msk.msra.mxu1 %vm39_vm7, %v422_v10 }
  0x11   :  { %338 = vmatmul.msk.f32.vlgmr.msra.gmra.mxu0 %vm64_vm8, %v62_v11  ;;  %344 = vmatmul.msk.f32.vlgmr.msra.gmra.mxu1 %vm64_vm8, %v62_v11 }
  0x12   :  { %134 = vperm.xlu0 %359, %v124_v16   ;;  %144 = vperm.xlu1 %360, %v126_v17  }
  0x13   :  { %204 = vperm.xlu2 %361, %v194_v23   ;;  %v284_v23 = vand.u32 127, %v31_v2 }
  0x15   :  { %vm287_vm1 = vcmp.lt.s32.totalorder %v284_v23, 8  ;;  %vm291_vm3 = vcmp.eq.s32.totalorder %v284_v23, 0 }
  0x19   :  { %339 = vmatmul.msk.f32.gmra.mxu0 %vm64_vm8, %v63_v12  ;;  %345 = vmatmul.msk.f32.gmra.mxu1 %vm64_vm8, %v63_v12 }
  0x1a   :  { %209 = vperm.xlu0 %359, %v195_v18   ;;  %214 = vperm.xlu1 %360, %v196_v19  }
  0x1b   :  { %233 = vperm.xlu2 %361, %v230_v30  }
  0x65   :  { %v200_v36 = vpop.permute.xlu2 %199 }
  0x6d   :  { %v205_v47 = vpop.permute.xlu2 %204 }
  0x75   :  { %v234_v0 = vpop.permute.xlu2 %233 }
  0x76   :  { %v236_v3 = vperm.slane %v234_v0, 0 }
  0x7a   :  { %v130_v33 = vpop.permute.xlu0 %129  ;;  %v140_v34 = vpop.permute.xlu1 %139 }
  0x84   :  { %v135_v38 = vpop.permute.xlu0 %134  ;;  %v145_v43 = vpop.permute.xlu1 %144 }
  0x8c   :  { %v210_v50 = vpop.permute.xlu0 %209  ;;  %v215_v56 = vpop.permute.xlu1 %214 }
  0x8e   :  { %v88_v21 = vpop.f32.mrf.mxu0  ;;  %v111_v22 = vpop.f32.mrf.mxu1 }
  0x8f   :  { %v117_v27 = vmul.f32 %v111_v22, %v88_v21 }
  0x96   :  { %v91_v24 = vpop.f32.mrf.mxu0  ;;  %v114_v25 = vpop.f32.mrf.mxu1 }
  0x97   :  { %v118_v26 = vmul.f32 %v114_v25, %v91_v24 }
  0x99   :  { %174 = vmatpush.msra.mxu2 %v118_v26  ;;  %353 = vmatpush.msra.mxu3 %v118_v26 }
  0x9b   :  { %175 = vmatpush.msra.mxu2 %v117_v27  ;;  %354 = vmatpush.msra.mxu3 %v117_v27 }
  0x9c   :  { %346 = vmatmul.msk.f32.vlgmr.msra.gmra.mxu2 %vm147_vm9, %v119_v28  ;;  %347 = vmatmul.msk.f32.vlgmr.msra.gmra.mxu3 %vm147_vm9, %v120_v29 }
  0xa4   :  { %348 = vmatmul.msk.f32.gmra.mxu3 %vm147_vm9, %v121_v31 }
  0xac   :  { %349 = vmatmul.msk.f32.gmra.mxu3 %vm147_vm9, %v122_v32 }
 0x11f   :  { %v180_v35 = vpop.f32.mrf.mxu3  ;;  %v177_v37 = vpop.f32.mrf.mxu2 }
 0x120   :  { %v178_v39 = vadd.f32 %v177_v37, %v130_v33  ;;  %v181_v40 = vadd.f32 %v180_v35, %v135_v38 }
 0x122   :  { %v189_v44 = vmax.f32 %v178_v39, 0.0  ;;  %v190_v45 = vmax.f32 %v181_v40, 0.0 }
 0x124   :  { %v217_v48 = vmul.f32 %v200_v36, %v189_v44  ;;  %v218_v49 = vmul.f32 %v205_v47, %v190_v45 }
 0x126   :  { %v221_v54 = vadd.f32 %v218_v49, %v217_v48 }
 0x127   :  { %v183_v41 = vpop.f32.mrf.mxu3 }
 0x128   :  { %v184_v42 = vadd.f32 %v183_v41, %v140_v34 }
 0x12a   :  { %v191_v46 = vmax.f32 %v184_v42, 0.0 }
 0x12c   :  { %v219_v52 = vmul.f32 %v210_v50, %v191_v46 }
 0x12e   :  { %v222_v57 = vadd.f32 %v221_v54, %v219_v52 }
 0x12f   :  { %v186_v51 = vpop.f32.mrf.mxu3 }
 0x130   :  { %v187_v53 = vadd.f32 %v186_v51, %v145_v43 }
 0x132   :  { %v192_v55 = vmax.f32 %v187_v53, 0.0 }
 0x134   :  { %v220_v58 = vmul.f32 %v215_v56, %v192_v55 }
 0x136   :  { %v223_v59 = vadd.f32 %v222_v57, %v220_v58 }
 0x138   :  { %v224_v60 = vrot.slane %v223_v59, 4 }
 0x13a   :  { %v225_v61 = vadd.f32 %v224_v60, %v223_v59 }
 0x13c   :  { %v226_v62 = vrot.slane %v225_v61, 2 }
 0x13e   :  { %v227_v63 = vadd.f32 %v226_v62, %v225_v61 }
 0x140   :  { %v228_v1 = vrot.slane %v227_v63, 1 }
 0x142   :  { %v229_v4 = vadd.f32 %v228_v1, %v227_v63 }
 0x144   :  { %v237_v5 = vadd.f32 %v236_v3, %v229_v4 }
 0x146   :  { %v350_v6 = vmul.f32 -1.442695, %v237_v5  ;;  %v351_v7 = vadd.f32 2.2832248, %v237_v5 }
 0x148   :  { %362 = vpow2.f32 %v350_v6  ;;  %v352_v8 = vmul.f32 -1.442695, %v351_v7 }
 0x14a   :  { %364 = vpow2.f32 %v352_v8 }
 0x14e   :  { %v363_v9 = vpop.eup %362 }
 0x14f   :  { %v241_v10 = vadd.f32 1.0, %v363_v9 }
 0x150   :  { %v365_v11 = vpop.eup %364 }
 0x151   :  { %366 = vrcp.f32 %v241_v10  ;;  %v266_v12 = vadd.f32 1.0, %v365_v11  ;;  %v253_v18 = vand.u32 2147483648, %v241_v10  ;;  %v251_v21 = vand.u32 2147483647, %v241_v10 }
 0x152   :  { %vm247_vm11 = vweird.f32 %v241_v10 }
 0x153   :  { %368 = vrcp.f32 %v266_v12  ;;  %v278_v22 = vand.u32 2147483648, %v266_v12  ;;  %v276_v25 = vand.u32 2147483647, %v266_v12  ;;  %v254_v27 = vor.u32 1.1754944e-38, %v253_v18 }
 0x154   :  { %vm272_vm14 = vweird.f32 %v266_v12  ;;  %vm252_vm15 = vcmp.eq.f32.partialorder %v251_v21, 8.507059e+37 }
 0x155   :  { %v279_v30 = vor.u32 1.1754944e-38, %v278_v22  ;;  %vm277_vm2 = vcmp.eq.f32.partialorder %v276_v25, 8.507059e+37 }
 0x157   :  { %v367_v13 = vpop.eup %366 }
 0x158   :  { %v243_v14 = vmul.f32 %v367_v13, %v241_v10  ;;  %vm248_vm10 = vweird.f32 %v367_v13 }
 0x159   :  { %v369_v15 = vpop.eup %368  ;;  %vm249_vm13 = vmor %vm247_vm11, %vm248_vm10 }
 0x15a   :  { %v268_v16 = vmul.f32 %v369_v15, %v266_v12  ;;  %v244_v17 = vsub.f32 1.0, %v243_v14  ;;  %vm273_vm12 = vweird.f32 %v369_v15 }
 0x15b   :  { %vm274_vm0 = vmor %vm272_vm14, %vm273_vm12 }
 0x15c   :  { %v269_v19 = vsub.f32 1.0, %v268_v16  ;;  %v245_v20 = vmul.f32 %v367_v13, %v244_v17 }
 0x15e   :  { %v270_v24 = vmul.f32 %v369_v15, %v269_v19  ;;  %v246_v26 = vadd.f32 %v367_v13, %v245_v20 }
 0x160   :  { %v271_v28 = vadd.f32 %v369_v15, %v270_v24  ;;  %v250_v29 = vsel %vm249_vm13, %v367_v13, %v246_v26 }
 0x161   :  { %v255_v31 = vsel %vm252_vm15, %v254_v27, %v250_v29 }
 0x162   :  { %v275_v32 = vsel %vm274_vm0, %v369_v15, %v271_v28  ;;  %v257_v33 = vmul.f32 1.2, %v255_v31 }
 0x163   :  { %v280_v34 = vsel %vm277_vm2, %v279_v30, %v275_v32 }
 0x164   :  { %v288_v2 = vsel %vm287_vm1, %v280_v34, 0.0  ;;  %v258_v35 = vadd.f32 -0.1, %v257_v33 }
 0x165   :  { %289 = vadd.xlane.f32.xlu0 %v288_v2 }
 0x166   :  { %v259_v36 = vmax.f32 %v258_v35, 0.0 }
 0x168   :  { %v260_v37 = vmin.f32 %v259_v36, 1.0 }
 0x16a   :  { %261 = vst [vmem:[#allocation3] sm:$0x1] %v260_v37 }
 0x16b   :  { %304 = dma.vmem_to_hbm [thread:$0]  %s300_s0, 16, %s302_s29, [#allocation4]  }
 0x1d8   :  { %v290_v38 = vpop.xlane.xlu0 %289 }
 0x1d9   :  { %v292_v39 = vsel %vm291_vm3, %v290_v38, 0.0 }
 0x1da   :  { %293 = vst [vmem:[#allocation5] sm:$0x1] %v292_v39 }
 0x1db   :  { %315 = dma.vmem_to_hbm [thread:$0]  %s311_s8, 16, %s313_s11, [#allocation6]  }
 0x1dc   :  { %418 = dma.done.wait [#allocation4], 16  }
 0x1dd   :  { %419 = vsyncadd [#allocation4], 4294967280 }
 0x1de   :  { %420 = dma.done.wait [#allocation6], 16  }
 0x1df   :  { %421 = vsyncadd [#allocation6], 4294967280 }
 0x1e0   :  { %324 = vsyncpa [#allocation4], 1 }
 0x1e1   :  { %325 = vsyncpa [#allocation6], 1 }

</bundles_post_ra>
